<compile_context>
chip_gen: v7x
topology: tpu7x:2x2x1
jax: 0.10.0
libtpu: 0.0.40
codegen_flags: <defaults>
</compile_context>

<pallas_src>
from functools import partial

import jax
import jax.numpy as jnp
from jax.experimental import pallas as pl
from jax.experimental.pallas import tpu as pltpu

LANE = 128


def _round_up(x, m):
    return (x + m - 1) // m * m


def _qnet_kernel(x_ref, w1_ref, b1_ref, w2_ref, b2_ref, o_ref):
    # All operands f32; MXU accumulates in f32.
    h = jnp.dot(x_ref[...], w1_ref[...],
                preferred_element_type=jnp.float32)          # (tile_b, H_p)
    h = jnp.maximum(h + b1_ref[...], 0.0)                    # bias + ReLU (VPU)
    y = jnp.dot(h, w2_ref[...],
                preferred_element_type=jnp.float32)          # (tile_b, D_out_p)
    o_ref[...] = (y + b2_ref[...]).astype(o_ref.dtype)


def prepare_params(w1, b1, w2, b2):
    """One-time padding of parameters (call at init / after each optimizer step).

    w1: (D_in, H), b1: (1, H), w2: (H, D_out), b2: (1, D_out).
    Only the lane (last) dims are padded to 128; w1's K dim stays unpadded.
    """
    D_in, H = w1.shape
    D_out = w2.shape[1]
    H_p = _round_up(H, LANE)
    D_out_p = _round_up(D_out, LANE)
    w1_p = jnp.pad(w1.astype(jnp.float32), ((0, 0), (0, H_p - H)))
    b1_p = jnp.pad(b1.astype(jnp.float32).reshape(1, H), ((0, 0), (0, H_p - H)))
    w2_p = jnp.pad(w2.astype(jnp.float32), ((0, H_p - H), (0, D_out_p - D_out)))
    b2_p = jnp.pad(b2.astype(jnp.float32).reshape(1, D_out),
                   ((0, 0), (0, D_out_p - D_out)))
    return w1_p, b1_p, w2_p, b2_p


@partial(jax.jit, static_argnames=("output_size",))
def linear_qnet_forward(x, w1_p, b1_p, w2_p, b2_p, *, output_size):
    """x: (B, D_in) f32; padded params from prepare_params(); returns (B, output_size)."""
    B, D_in = x.shape
    H_p = w1_p.shape[1]
    D_out_p = w2_p.shape[1]

    # Typical (RL-style) batches: one grid step, full-array blocks, no padding
    # or copy of x at all.  Large batches: exactly 2 balanced "parallel" steps
    # (dual TensorCore on v7x) with minimal row padding.
    if B <= 1024:
        n_steps = 1
        tile_b = B
        B_p = B
        x_in = x
    else:
        n_steps = 2
        tile_b = _round_up(pl.cdiv(B, n_steps), 8)
        B_p = n_steps * tile_b
        x_in = jnp.pad(x, ((0, B_p - B), (0, 0)))

    flops = 2 * B_p * D_in * H_p + 2 * B_p * H_p * D_out_p
    bytes_accessed = 4 * (x_in.size + w1_p.size + b1_p.size + w2_p.size
                          + b2_p.size + B_p * D_out_p)

    out = pl.pallas_call(
        _qnet_kernel,
        out_shape=jax.ShapeDtypeStruct((B_p, D_out_p), jnp.float32),
        grid_spec=pl.GridSpec(
            grid=(n_steps,),
            in_specs=[
                # x tile: last dim = full array dim (legal), batch dim streams.
                pl.BlockSpec((tile_b, D_in), lambda i: (i, 0)),
                # Weights / biases: constant block index -> resident in VMEM.
                pl.BlockSpec(w1_p.shape, lambda i: (0, 0)),
                pl.BlockSpec(b1_p.shape, lambda i: (0, 0)),
                pl.BlockSpec(w2_p.shape, lambda i: (0, 0)),
                pl.BlockSpec(b2_p.shape, lambda i: (0, 0)),
            ],
            out_specs=pl.BlockSpec((tile_b, D_out_p), lambda i: (i, 0)),
        ),
        compiler_params=pltpu.CompilerParams(
            dimension_semantics=("parallel",),   # 2 TCs on v7x; no-op v5e/v6e
        ),
        cost_estimate=pl.CostEstimate(
            flops=flops, transcendentals=0, bytes_accessed=bytes_accessed),
    )(x_in, w1_p, b1_p, w2_p, b2_p)

    # Slice off lane padding (and any padded batch rows, whose values are
    # ReLU(b1)@w2+b2 garbage and must not be returned).
    return out[:B, :output_size].astype(x.dtype)


def init_params(key, input_size, hidden_size, output_size):
    """Deterministic init mirroring nn.Linear's U(-1/sqrt(fan_in), 1/sqrt(fan_in))."""
    k1, k2, k3, k4 = jax.random.split(key, 4)
    bound1 = 1.0 / jnp.sqrt(input_size)
    bound2 = 1.0 / jnp.sqrt(hidden_size)
    w1 = jax.random.uniform(k1, (input_size, hidden_size), jnp.float32,
                            -bound1, bound1)
    b1 = jax.random.uniform(k2, (1, hidden_size), jnp.float32, -bound1, bound1)
    w2 = jax.random.uniform(k3, (hidden_size, output_size), jnp.float32,
                            -bound2, bound2)
    b2 = jax.random.uniform(k4, (1, output_size), jnp.float32, -bound2, bound2)
    return w1, b1, w2, b2


if __name__ == "__main__":
    # Shapes consistent with the module's forward (plain 2-layer MLP).
    # TODO(synk): save()/load() are host-side file I/O, not kernel work.
    input_size, hidden_size, output_size = 16, 32, 4

    key = jax.random.PRNGKey(0)
    kx_small, kx_mid, kx_big, kp = jax.random.split(key, 4)
    w1, b1, w2, b2 = init_params(kp, input_size, hidden_size, output_size)

    # One-time parameter prep (hoisted out of the per-call forward path).
    params = jax.block_until_ready(prepare_params(w1, b1, w2, b2))

    # batch=2: RL-style single-block path; batch=300: single block, no padding;
    # batch=2002: 2-step parallel grid with minimal row padding.
    for batch, kx in ((2, kx_small), (300, kx_mid), (2002, kx_big)):
        x = jax.random.normal(kx, (batch, input_size), jnp.float32)
        out = jax.block_until_ready(
            linear_qnet_forward(x, *params, output_size=output_size))

        # Pure-JAX f32 reference.  Tolerance only accounts for possible MXU
        # default-precision (bf16-truncation) differences between the Pallas
        # dot and the XLA reference dot; no explicit bf16 casts remain.
        ref = jnp.maximum(x @ w1 + b1, 0.0) @ w2 + b2
        assert out.shape == (batch, output_size)
        assert jnp.allclose(out, ref, atol=2e-2, rtol=2e-2), (
            float(jnp.max(jnp.abs(out - ref))))

    print("KERNEL_OK")
</pallas_src>

<mosaic_0001>
module attributes {stable_mosaic.version = 11 : i64} {
  func.func @_qnet_kernel(%arg0: i32, %arg1: memref<2x16xf32, #tpu.memory_space<vmem>>, %arg2: memref<16x128xf32, #tpu.memory_space<vmem>>, %arg3: memref<1x128xf32, #tpu.memory_space<vmem>>, %arg4: memref<128x128xf32, #tpu.memory_space<vmem>>, %arg5: memref<1x128xf32, #tpu.memory_space<vmem>>, %arg6: memref<2x128xf32, #tpu.memory_space<vmem>>) attributes {dimension_semantics = [#tpu.dimension_semantics<parallel>], iteration_bounds = array<i64: 1>, scalar_prefetch = 0 : i64, scratch_operands = 0 : i64, tpu.core_type = #tpu.core_type<tc>, window_params = [{transform_indices = @transform_0, window_bounds = array<i64: 2, 16>}, {pipeline_mode = #tpu.pipeline_mode<synchronous>, transform_indices = @transform_1, window_bounds = array<i64: 16, 128>}, {pipeline_mode = #tpu.pipeline_mode<synchronous>, transform_indices = @transform_2, window_bounds = array<i64: 1, 128>}, {pipeline_mode = #tpu.pipeline_mode<synchronous>, transform_indices = @transform_3, window_bounds = array<i64: 128, 128>}, {pipeline_mode = #tpu.pipeline_mode<synchronous>, transform_indices = @transform_4, window_bounds = array<i64: 1, 128>}, {transform_indices = @transform_5, window_bounds = array<i64: 2, 128>}]} {
    %c0 = arith.constant 0 : index
    %c0_0 = arith.constant 0 : index
    %0 = vector.load %arg1[%c0, %c0_0] : memref<2x16xf32, #tpu.memory_space<vmem>>, vector<2x16xf32>
    %c0_1 = arith.constant 0 : index
    %c0_2 = arith.constant 0 : index
    %1 = vector.load %arg2[%c0_1, %c0_2] : memref<16x128xf32, #tpu.memory_space<vmem>>, vector<16x128xf32>
    %cst = arith.constant dense<0.000000e+00> : vector<2x128xf32>
    %2 = tpu.matmul %0, %1, %cst {dimension_numbers = #tpu.dot_dimension_numbers<[1], [0], [0], [1], [0, 0, 1, 1], [], []>} : vector<2x16xf32>, vector<16x128xf32>, vector<2x128xf32> -> vector<2x128xf32>
    %c0_3 = arith.constant 0 : index
    %c0_4 = arith.constant 0 : index
    %3 = vector.load %arg3[%c0_3, %c0_4] : memref<1x128xf32, #tpu.memory_space<vmem>>, vector<1x128xf32>
    %4 = vector.broadcast %3 : vector<1x128xf32> to vector<2x128xf32>
    %5 = arith.addf %2, %4 : vector<2x128xf32>
    %cst_5 = arith.constant 0.000000e+00 : f32
    %6 = vector.broadcast %cst_5 : f32 to vector<2x128xf32>
    %7 = arith.maximumf %5, %6 : vector<2x128xf32>
    %c0_6 = arith.constant 0 : index
    %c0_7 = arith.constant 0 : index
    %8 = vector.load %arg4[%c0_6, %c0_7] : memref<128x128xf32, #tpu.memory_space<vmem>>, vector<128x128xf32>
    %cst_8 = arith.constant dense<0.000000e+00> : vector<2x128xf32>
    %9 = tpu.matmul %7, %8, %cst_8 {dimension_numbers = #tpu.dot_dimension_numbers<[1], [0], [0], [1], [0, 0, 1, 1], [], []>} : vector<2x128xf32>, vector<128x128xf32>, vector<2x128xf32> -> vector<2x128xf32>
    %c0_9 = arith.constant 0 : index
    %c0_10 = arith.constant 0 : index
    %10 = vector.load %arg5[%c0_9, %c0_10] : memref<1x128xf32, #tpu.memory_space<vmem>>, vector<1x128xf32>
    %11 = vector.broadcast %10 : vector<1x128xf32> to vector<2x128xf32>
    %12 = arith.addf %9, %11 : vector<2x128xf32>
    %c0_11 = arith.constant 0 : index
    %c0_12 = arith.constant 0 : index
    %13 = vector.load %arg6[%c0_11, %c0_12] : memref<2x128xf32, #tpu.memory_space<vmem>>, vector<2x128xf32>
    tpu.vector_store %arg6[%c0_11, %c0_12], %12 {strides = array<i32>} : memref<2x128xf32, #tpu.memory_space<vmem>>, vector<2x128xf32>,
    return
  }
  func.func @transform_0(%arg0: i32) -> (i32, i32) {
    %c0_i32 = arith.constant 0 : i32
    %c0_i32_0 = arith.constant 0 : i32
    return %arg0, %c0_i32 : i32, i32
  }
  func.func @transform_1(%arg0: i32) -> (i32, i32) {
    %c0_i32 = arith.constant 0 : i32
    %c0_i32_0 = arith.constant 0 : i32
    %c0_i32_1 = arith.constant 0 : i32
    return %c0_i32, %c0_i32_0 : i32, i32
  }
  func.func @transform_2(%arg0: i32) -> (i32, i32) {
    %c0_i32 = arith.constant 0 : i32
    %c0_i32_0 = arith.constant 0 : i32
    %c0_i32_1 = arith.constant 0 : i32
    return %c0_i32, %c0_i32_0 : i32, i32
  }
  func.func @transform_3(%arg0: i32) -> (i32, i32) {
    %c0_i32 = arith.constant 0 : i32
    %c0_i32_0 = arith.constant 0 : i32
    %c0_i32_1 = arith.constant 0 : i32
    return %c0_i32, %c0_i32_0 : i32, i32
  }
  func.func @transform_4(%arg0: i32) -> (i32, i32) {
    %c0_i32 = arith.constant 0 : i32
    %c0_i32_0 = arith.constant 0 : i32
    %c0_i32_1 = arith.constant 0 : i32
    return %c0_i32, %c0_i32_0 : i32, i32
  }
  func.func @transform_5(%arg0: i32) -> (i32, i32) {
    %c0_i32 = arith.constant 0 : i32
    %c0_i32_0 = arith.constant 0 : i32
    return %arg0, %c0_i32 : i32, i32
  }
}

</mosaic_0001>

<bundles_post_ra>
// kernel: linear_qnet_forward.1
= control target key start
LH: loop header
LB: loop body
LE: loop exit
PB: predicated region body
PF: predicated region fallthrough
CT: control target
= control target key end

     0   :  { %10 = vsyncpa [#allocation3], 0  ;;  %s549_s0 = inlined_call_operand.hbm [shape: f32[2,16], index: 0, kind: input, shape index: {}]   ;;  %s550_s1 = inlined_call_operand.hbm [shape: f32[16,128], index: 1, kind: input, shape index: {}]   ;;  %s551_s2 = inlined_call_operand.vmem [shape: f32[1,128], index: 2, kind: input, shape index: {}]   ;;  %s552_s3 = inlined_call_operand.hbm [shape: f32[128,128], index: 3, kind: input, shape index: {}]   ;;  %s553_s4 = inlined_call_operand.vmem [shape: f32[1,128], index: 4, kind: input, shape index: {}]   ;;  %s554_s5 = inlined_call_operand.hbm [shape: f32[2,128], index: 5, kind: output, shape index: {}]  }
   0x1   :  { %11 = vsyncpa [#allocation6], 0 }
   0x2   :  { %12 = vsyncpa [#allocation4], 0  ;;  %s450_s18 = smov [#allocation5]   ;;  %s356_s22 = scalar_lea.hbm %s550_s1, 256 }
   0x3   :  { %s28_s19 = sshll.u32 %s450_s18, 4  ;;  %p357_p0 = scmp.ne.s32.totalorder %s550_s1, %s356_s22  ;;  %s29_s19 = int_to_ptr.vmem [resolvable:$true] %s28_s19 }
   0x4   :  { %p360_p1 = scmp.lt.u32.totalorder %s356_s22, %s550_s1 }
   0x6   :  { %p362_p2 = pnand %p360_p1, %p357_p0 }
   0x8   :  { %365 = shalt.err (!%p362_p2)
}
   0x9   :  { %s366_s27 = scalar_lea.vmem %s29_s19, 256  ;;  %p371_p4 = scmp.lt.s32.totalorder %s29_s19, %s29_s19 }
   0xa   :  { %p367_p3 = scmp.ne.s32.totalorder %s29_s19, %s366_s27  ;;  %p372_p5 = scmp.lt.s32.totalorder %s366_s27, %s366_s27 }
   0xc   :  { %p373_p6 = por %p372_p5, %p371_p4 }
   0xe   :  { %p374_p7 = pnand %p373_p6, %p367_p3 }
  0x10   :  { %377 = shalt.err (!%p374_p7)
}
  0x11   :  { %s451_s28 = smov 128   ;;  %s452_s29 = smov 8  }
  0x12   :  { %34 = dma.hbm_to_vmem [thread:$0]  %s550_s1, 256, %s29_s19, [#allocation6], %s451_s28, %s451_s28, %s452_s29  }
  0x13   :  { %s453_s7 = smov [#allocation2]   ;;  %s454_s9 = smov [#allocation7]  }
  0x14   :  { %s19_s8 = sshll.u32 %s453_s7, 4  ;;  %s42_s10 = sshll.u32 %s454_s9, 4  ;;  %s20_s8 = int_to_ptr.vmem [resolvable:$true] %s19_s8  ;;  %s43_s10 = int_to_ptr.vmem [resolvable:$true] %s42_s10 }
  0x15   :  { %s378_s13 = scalar_lea.hbm %s549_s0, 32 }
  0x16   :  { %p379_p8 = scmp.ne.s32.totalorder %s549_s0, %s378_s13  ;;  %p382_p9 = scmp.lt.u32.totalorder %s378_s13, %s549_s0 }
  0x18   :  { %p384_p10 = pnand %p382_p9, %p379_p8 }
  0x1a   :  { %387 = shalt.err (!%p384_p10)
}
  0x1b   :  { %s388_s1 = scalar_lea.vmem %s20_s8, 32  ;;  %p393_p12 = scmp.lt.s32.totalorder %s20_s8, %s20_s8 }
  0x1c   :  { %p389_p11 = scmp.ne.s32.totalorder %s20_s8, %s388_s1  ;;  %p394_p13 = scmp.lt.s32.totalorder %s388_s1, %s388_s1 }
  0x1e   :  { %p395_p0 = por %p394_p13, %p393_p12 }
  0x20   :  { %p396_p1 = pnand %p395_p0, %p389_p11 }
  0x22   :  { %399 = shalt.err (!%p396_p1)
}
  0x23   :  { %22 = dma.hbm_to_vmem [thread:$0]  %s549_s0, 32, %s20_s8, [#allocation3]  }
  0x24   :  { %s400_s22 = scalar_lea.hbm %s552_s3, 2048 }
  0x25   :  { %p401_p2 = scmp.ne.s32.totalorder %s552_s3, %s400_s22  ;;  %p404_p3 = scmp.lt.u32.totalorder %s400_s22, %s552_s3 }
  0x27   :  { %p406_p4 = pnand %p404_p3, %p401_p2 }
  0x29   :  { %409 = shalt.err (!%p406_p4)
}
  0x2a   :  { %s410_s27 = scalar_lea.vmem %s43_s10, 2048  ;;  %p415_p6 = scmp.lt.s32.totalorder %s43_s10, %s43_s10 }
  0x2b   :  { %p411_p5 = scmp.ne.s32.totalorder %s43_s10, %s410_s27  ;;  %p416_p7 = scmp.lt.s32.totalorder %s410_s27, %s410_s27 }
  0x2d   :  { %p417_p8 = por %p416_p7, %p415_p6 }
  0x2f   :  { %p418_p9 = pnand %p417_p8, %p411_p5 }
  0x31   :  { %421 = shalt.err (!%p418_p9)
}
  0x32   :  { %48 = dma.hbm_to_vmem [thread:$0]  %s552_s3, 2048, %s43_s10, [#allocation6], %s451_s28, %s451_s28, %s452_s29  }
  0x33   :  { %444 = dma.done.wait [#allocation3], 32  }
  0x34   :  { %445 = vsyncadd [#allocation3], 4294967264 }
  0x35   :  { %446 = dma.done.wait [#allocation6], 2304  }
  0x36   :  { %447 = vsyncadd [#allocation6], 4294964992  ;;  %v455_v0 = vmov 0.0|0.0   ;;  %vm456_vm0 = vmmov 0   ;;  %v457_v1 = vmov 0.0   ;;  %v61_v2 = vld [vmem:[#allocation5] sm:$0xff] }
  0x37   :  { %320 = vmatprep.subr.bf16.mxu0 %v455_v0  ;;  %282 = vmatprep.mubr.msk.f32.mxu0 %vm456_vm0, %v457_v1  ;;  %v62_v3 = vld [vmem:[#allocation5 + $0x8] sm:$0xff]  ;;  %v145_v5 = vld [vmem:[#allocation7] sm:$0xff]  ;;  %v146_v6 = vld [vmem:[#allocation7 + $0x8] sm:$0xff]  ;;  %vm70_vm1 = vcmask 130048   ;;  %s458_s7 = smov [#allocation8]  }
  0x38   :  { %323 = vmatprep.subr.bf16.mxu1 %v455_v0  ;;  %317 = vmatprep.mubr.msk.f32.mxu1 %vm456_vm0, %v457_v1  ;;  %v321_v4 = vpack.c.bf16 %v62_v3, %v61_v2  ;;  %v147_v7 = vld [vmem:[#allocation7 + $0x10] sm:$0xff]  ;;  %v324_v8 = vpack.c.bf16 %v146_v6, %v145_v5  ;;  %v148_v9 = vld [vmem:[#allocation7 + $0x18] sm:$0xff]  ;;  %v60_v10 = vld [vmem:[#allocation2] sm:$0x3]  ;;  %s245_s8 = sshll.u32 %s458_s7, 4  ;;  %s246_s8 = int_to_ptr.vmem [resolvable:$true] %s245_s8 }
  0x39   :  { %v327_v11 = vpack.c.bf16 %v148_v9, %v147_v7  ;;  %v149_v12 = vld [vmem:[#allocation7 + $0x20] sm:$0xff]  ;;  %v150_v13 = vld [vmem:[#allocation7 + $0x28] sm:$0xff]  ;;  %v151_v15 = vld [vmem:[#allocation7 + $0x30] sm:$0xff]  ;;  %s422_s9 = scalar_lea.vmem %s246_s8, 32  ;;  %p427_p11 = scmp.lt.s32.totalorder %s246_s8, %s246_s8 }
  0x3a   :  { %322 = vmatpush3.bf16.msra.mxu0 %v321_v4  ;;  %325 = vmatpush3.bf16.msra.mxu1 %v324_v8  ;;  %v330_v14 = vpack.c.bf16 %v150_v13, %v149_v12  ;;  %v152_v16 = vld [vmem:[#allocation7 + $0x38] sm:$0xff]  ;;  %v153_v18 = vld [vmem:[#allocation7 + $0x40] sm:$0xff]  ;;  %v154_v19 = vld [vmem:[#allocation7 + $0x48] sm:$0xff]  ;;  %p423_p10 = scmp.ne.s32.totalorder %s246_s8, %s422_s9  ;;  %p428_p12 = scmp.lt.s32.totalorder %s422_s9, %s422_s9 }
  0x3b   :  { %326 = vmatprep.subr.bf16.mxu1 %v455_v0  ;;  %v333_v17 = vpack.c.bf16 %v152_v16, %v151_v15  ;;  %v336_v20 = vpack.c.bf16 %v154_v19, %v153_v18  ;;  %v155_v21 = vld [vmem:[#allocation7 + $0x50] sm:$0xff]  ;;  %v156_v22 = vld [vmem:[#allocation7 + $0x58] sm:$0xff]  ;;  %v157_v24 = vld [vmem:[#allocation7 + $0x60] sm:$0xff] }
  0x3c   :  { %v339_v23 = vpack.c.bf16 %v156_v22, %v155_v21  ;;  %v158_v25 = vld [vmem:[#allocation7 + $0x68] sm:$0xff]  ;;  %v159_v27 = vld [vmem:[#allocation7 + $0x70] sm:$0xff]  ;;  %v160_v28 = vld [vmem:[#allocation7 + $0x78] sm:$0xff]  ;;  %p429_p13 = por %p428_p12, %p427_p11 }
  0x3d   :  { %283 = vmatmul.mubr.msk.f32.vlgmr.msra.gmra.mrb[0].mxu0 %vm70_vm1, %v60_v10  ;;  %v342_v26 = vpack.c.bf16 %v158_v25, %v157_v24  ;;  %v345_v29 = vpack.c.bf16 %v160_v28, %v159_v27  ;;  %v255_v30 = vld [vmem:[%s551_s2] ss:$0 sm:$0xff] }
  0x3e   :  { %328 = vmatpush3.bf16.msra.mxu1 %v327_v11  ;;  %v257_v35 = vld [vmem:[%s553_s4] ss:$0 sm:$0xff]  ;;  %p430_p0 = pnand %p429_p13, %p423_p10 }
  0x3f   :  { %329 = vmatprep.subr.bf16.mxu1 %v455_v0 }
  0x42   :  { %331 = vmatpush3.bf16.msra.mxu1 %v330_v14 }
  0x43   :  { %332 = vmatprep.subr.bf16.mxu1 %v455_v0 }
  0x46   :  { %334 = vmatpush3.bf16.msra.mxu1 %v333_v17 }
  0x47   :  { %335 = vmatprep.subr.bf16.mxu1 %v455_v0 }
  0x4a   :  { %337 = vmatpush3.bf16.msra.mxu1 %v336_v20 }
  0x4b   :  { %338 = vmatprep.subr.bf16.mxu1 %v455_v0 }
  0x4e   :  { %340 = vmatpush3.bf16.msra.mxu1 %v339_v23 }
  0x4f   :  { %341 = vmatprep.subr.bf16.mxu1 %v455_v0 }
  0x52   :  { %343 = vmatpush3.bf16.msra.mxu1 %v342_v26 }
  0x53   :  { %344 = vmatprep.subr.bf16.mxu1 %v455_v0 }
  0x56   :  { %346 = vmatpush3.bf16.msra.mxu1 %v345_v29 }
 0x110   :  { %v140_v31 = vpop.f32.mrb[0].mxu0 }
 0x111   :  { %v141_v32 = vadd.f32 %v255_v30, %v140_v31  ;;  %v284_v33 = vpop.f32.mrb[1].mxu0 }
 0x113   :  { %v144_v34 = vmax.f32 %v141_v32, 0.0 }
 0x115   :  { %318 = vmatmul.mubr.f32.vlgmr.msra.gmra.mrb[0].mxu1 %v144_v34 }
 0x1e8   :  { %v234_v36 = vpop.f32.mrb[0].mxu1 }
 0x1e9   :  { %v235_v37 = vadd.f32 %v257_v35, %v234_v36  ;;  %v319_v38 = vpop.f32.mrb[1].mxu1 }
 0x1eb   :  { %238 = vst [vmem:[#allocation8] sm:$0x3] %v235_v37 }
 0x1ec   :  { %433 = shalt.err (!%p430_p0)
}
 0x1ed   :  { %s434_s11 = scalar_lea.hbm %s554_s5, 32 }
 0x1ee   :  { %p435_p1 = scmp.ne.s32.totalorder %s554_s5, %s434_s11  ;;  %p438_p2 = scmp.lt.u32.totalorder %s434_s11, %s554_s5 }
 0x1f0   :  { %p440_p3 = pnand %p438_p2, %p435_p1 }
 0x1f2   :  { %443 = shalt.err (!%p440_p3)
}
 0x1f3   :  { %248 = dma.vmem_to_hbm [thread:$0]  %s246_s8, 32, %s554_s5, [#allocation4]  }
 0x1f4   :  { %448 = dma.done.wait [#allocation4], 32  }
 0x1f5   :  { %449 = vsyncadd [#allocation4], 4294967264 }
 0x1f6   :  { %252 = vsyncpa [#allocation3], 1 }
 0x1f7   :  { %253 = vsyncpa [#allocation6], 1 }
 0x1f8   :  { %254 = vsyncpa [#allocation4], 1 }

</bundles_post_ra>
